<compile_context>
chip_gen: v6e
topology: v6e:2x2x1
jax: 0.10.0
libtpu: 0.0.40
codegen_flags: <defaults>
</compile_context>

<pallas_src>
import functools

import jax
import jax.numpy as jnp
from jax.experimental import pallas as pl
from jax.experimental.pallas import tpu as pltpu


# ----------------------------------------------------------------------------
# Kernel 1: Wh = h @ W and the two score projections.
# ----------------------------------------------------------------------------
def _wh_kernel(h_ref, w_ref, a_ref, wh_ref, s_ref):
    """
    h_ref : (tn, F_in_p)      row tile of the (padded) node features
    w_ref : (F_in_p, F_out_p) weight matrix (constant block)
    a_ref : (F_out_p, 2)      column 0 = a[:F_out], column 1 = a[F_out:]
    wh_ref: (tn, F_out_p)     output Wh tile (lane-dense, F_out_p % 128 == 0)
    s_ref : (tn, 2)           output scores [s1, s2] per row
    """
    wh = jnp.dot(h_ref[...], w_ref[...], preferred_element_type=jnp.float32)
    wh_ref[...] = wh.astype(wh_ref.dtype)
    s_ref[...] = jnp.dot(wh, a_ref[...],
                         preferred_element_type=jnp.float32).astype(s_ref.dtype)


# ----------------------------------------------------------------------------
# Kernel 2: masked attention softmax + aggregation + ELU.
# ----------------------------------------------------------------------------
def _attn_kernel(s1_ref, s2_ref, adj_ref, wh_ref, o_ref, *, alpha, concat):
    """
    s1_ref : (tn, 1)        per-row score  (Wh @ a[:F]) for this row tile
    s2_ref : (1, Np)        per-column score (Wh @ a[F:]) for all nodes
    adj_ref: (tn, Np)       adjacency rows for this tile (float, >0 == edge)
    wh_ref : (Np, F_out_p)  full Wh (constant block)
    o_ref  : (tn, F_out_p)  output tile (lane-dense)
    """
    e = s1_ref[...] + s2_ref[...]                    # (tn, Np) broadcast add
    e = jnp.where(e >= 0.0, e, alpha * e)            # LeakyReLU(alpha)
    e = jnp.where(adj_ref[...] > 0.0, e, -9e15)      # mask non-edges

    # Row-wise softmax (numerically stable).
    m = jnp.max(e, axis=-1, keepdims=True)
    p = jnp.exp(e - m)
    denom = jnp.sum(p, axis=-1, keepdims=True)
    attn = p / denom
    # TODO(synk): training-mode dropout on `attn` not applied (inference path).

    hp = jnp.dot(attn, wh_ref[...], preferred_element_type=jnp.float32)
    if concat:
        # ELU (F.elu, alpha=1). minimum() keeps the unselected branch finite.
        hp = jnp.where(hp > 0.0, hp, jnp.exp(jnp.minimum(hp, 0.0)) - 1.0)
    o_ref[...] = hp.astype(o_ref.dtype)


# ----------------------------------------------------------------------------
# Wrapper.
# ----------------------------------------------------------------------------
def _round_up(x, m):
    return ((x + m - 1) // m) * m


def gat_forward(h, adj, W, a, *, alpha=0.01, concat=True, row_tile=128):
    """Forward pass of GraphAttentionLayer (inference; dropout disabled)."""
    N, F_in = h.shape
    F_out = W.shape[1]
    assert a.shape == (2 * F_out, 1)

    # --- padding for lane density / tiling -----------------------------------
    tn = min(row_tile, _round_up(N, 8))
    Np = _round_up(N, tn)
    F_in_p = _round_up(F_in, 128)
    F_out_p = _round_up(F_out, 128)
    n_tiles = Np // tn

    f32 = jnp.float32  # NOTE: cast h_p/W_p/wh to bf16 here for ~2x MXU at scale.
    h_p = jnp.zeros((Np, F_in_p), f32).at[:N, :F_in].set(h.astype(f32))
    W_p = jnp.zeros((F_in_p, F_out_p), f32).at[:F_in, :F_out].set(W.astype(f32))
    adj_p = jnp.zeros((Np, Np), f32).at[:N, :N].set(adj.astype(f32))
    a_pair = jnp.zeros((F_out_p, 2), f32)
    a_pair = a_pair.at[:F_out, 0].set(a[:F_out, 0].astype(f32))
    a_pair = a_pair.at[:F_out, 1].set(a[F_out:, 0].astype(f32))

    # --- kernel 1: Wh and scores ---------------------------------------------
    wh, s = pl.pallas_call(
        _wh_kernel,
        out_shape=(jax.ShapeDtypeStruct((Np, F_out_p), f32),
                   jax.ShapeDtypeStruct((Np, 2), f32)),
        grid_spec=pltpu.PrefetchScalarGridSpec(
            num_scalar_prefetch=0,
            grid=(n_tiles,),
            in_specs=[
                pl.BlockSpec((tn, F_in_p), lambda i: (i, 0)),
                pl.BlockSpec((F_in_p, F_out_p), lambda i: (0, 0)),
                pl.BlockSpec((F_out_p, 2), lambda i: (0, 0)),
            ],
            out_specs=[
                pl.BlockSpec((tn, F_out_p), lambda i: (i, 0)),
                pl.BlockSpec((tn, 2), lambda i: (i, 0)),
            ],
        ),
        compiler_params=pltpu.CompilerParams(dimension_semantics=("parallel",)),
        cost_estimate=pl.CostEstimate(
            flops=2 * Np * F_in_p * F_out_p + 4 * Np * F_out_p,
            transcendentals=0,
            bytes_accessed=4 * (Np * F_in_p + F_in_p * F_out_p
                                + Np * F_out_p + 2 * Np),
        ),
    )(h_p, W_p, a_pair)

    # Tiny glue: split scores and present s2 as a lane-major row vector.
    s1 = s[:, 0:1]                    # (Np, 1)
    s2_row = s[:, 1].reshape(1, Np)   # (1, Np)

    # --- kernel 2: masked attention ------------------------------------------
    out = pl.pallas_call(
        functools.partial(_attn_kernel, alpha=float(alpha), concat=bool(concat)),
        out_shape=jax.ShapeDtypeStruct((Np, F_out_p), f32),
        grid_spec=pltpu.PrefetchScalarGridSpec(
            num_scalar_prefetch=0,
            grid=(n_tiles,),
            in_specs=[
                pl.BlockSpec((tn, 1), lambda i: (i, 0)),
                pl.BlockSpec((1, Np), lambda i: (0, 0)),
                pl.BlockSpec((tn, Np), lambda i: (i, 0)),
                pl.BlockSpec((Np, F_out_p), lambda i: (0, 0)),
            ],
            out_specs=pl.BlockSpec((tn, F_out_p), lambda i: (i, 0)),
        ),
        compiler_params=pltpu.CompilerParams(dimension_semantics=("parallel",)),
        cost_estimate=pl.CostEstimate(
            flops=2 * Np * Np * F_out_p + 8 * Np * Np,
            transcendentals=Np * Np,
            bytes_accessed=4 * (Np * Np + 2 * Np * F_out_p + 2 * Np),
        ),
    )(s1, s2_row, adj_p, wh)

    return out[:N, :F_out]


# ----------------------------------------------------------------------------
# Pure-JAX reference and init helpers.
# ----------------------------------------------------------------------------
def gat_reference(h, adj, W, a, *, alpha=0.01, concat=True):
    F_out = W.shape[1]
    Wh = h @ W
    Wh1 = Wh @ a[:F_out, :]
    Wh2 = Wh @ a[F_out:, :]
    e = Wh1 + Wh2.T
    e = jnp.where(e >= 0.0, e, alpha * e)
    att = jnp.where(adj > 0, e, -9e15)
    att = jax.nn.softmax(att, axis=1)
    hp = att @ Wh
    return jax.nn.elu(hp) if concat else hp


def xavier_uniform(key, shape, gain=1.414):
    fan_in, fan_out = shape[0], shape[1]
    bound = gain * (6.0 / (fan_in + fan_out)) ** 0.5
    return jax.random.uniform(key, shape, jnp.float32, -bound, bound)


# ----------------------------------------------------------------------------
if __name__ == "__main__":
    # GraphAttentionLayer(in_features=48, out_features=96, alpha=0.01, concat=True)
    N, F_in, F_out = 200, 48, 96          # ragged on purpose: exercises padding
    alpha, concat = 0.01, True

    key = jax.random.PRNGKey(0)
    k1, k2, k3, k4 = jax.random.split(key, 4)
    W = xavier_uniform(k1, (F_in, F_out))
    a = xavier_uniform(k2, (2 * F_out, 1))
    h = jax.random.normal(k3, (N, F_in), jnp.float32)
    adj = (jax.random.uniform(k4, (N, N)) < 0.2).astype(jnp.float32)
    adj = jnp.maximum(adj, jnp.eye(N, dtype=jnp.float32))  # self-loops

    out = gat_forward(h, adj, W, a, alpha=alpha, concat=concat)
    out = jax.block_until_ready(out)

    ref = gat_reference(h, adj, W, a, alpha=alpha, concat=concat)
    assert out.shape == (N, F_out)
    if not bool(jnp.all(jnp.isfinite(out))):
        raise AssertionError("non-finite values in kernel output")
    max_err = float(jnp.max(jnp.abs(out - ref)))
    if max_err > 2e-3:
        raise AssertionError(f"Pallas kernel mismatch vs reference: {max_err}")

    print("KERNEL_OK")
</pallas_src>

<mosaic_0001>
module attributes {stable_mosaic.version = 11 : i64} {
  func.func @_wh_kernel(%arg0: i32, %arg1: memref<128x128xf32, #tpu.memory_space<vmem>>, %arg2: memref<128x128xf32, #tpu.memory_space<vmem>>, %arg3: memref<128x2xf32, #tpu.memory_space<vmem>>, %arg4: memref<128x128xf32, #tpu.memory_space<vmem>>, %arg5: memref<128x2xf32, #tpu.memory_space<vmem>>) attributes {dimension_semantics = [#tpu.dimension_semantics<parallel>], iteration_bounds = array<i64: 2>, scalar_prefetch = 0 : i64, scratch_operands = 0 : i64, tpu.core_type = #tpu.core_type<tc>, window_params = [{transform_indices = @transform_0, window_bounds = array<i64: 128, 128>}, {pipeline_mode = #tpu.pipeline_mode<synchronous>, transform_indices = @transform_1, window_bounds = array<i64: 128, 128>}, {pipeline_mode = #tpu.pipeline_mode<synchronous>, transform_indices = @transform_2, window_bounds = array<i64: 128, 2>}, {transform_indices = @transform_3, window_bounds = array<i64: 128, 128>}, {transform_indices = @transform_4, window_bounds = array<i64: 128, 2>}]} {
    %c0 = arith.constant 0 : index
    %c0_0 = arith.constant 0 : index
    %0 = vector.load %arg1[%c0, %c0_0] : memref<128x128xf32, #tpu.memory_space<vmem>>, vector<128x128xf32>
    %c0_1 = arith.constant 0 : index
    %c0_2 = arith.constant 0 : index
    %1 = vector.load %arg2[%c0_1, %c0_2] : memref<128x128xf32, #tpu.memory_space<vmem>>, vector<128x128xf32>
    %cst = arith.constant dense<0.000000e+00> : vector<128x128xf32>
    %2 = tpu.matmul %0, %1, %cst {dimension_numbers = #tpu.dot_dimension_numbers<[1], [0], [0], [1], [0, 0, 1, 1], [], []>} : vector<128x128xf32>, vector<128x128xf32>, vector<128x128xf32> -> vector<128x128xf32>
    %c0_3 = arith.constant 0 : index
    %c0_4 = arith.constant 0 : index
    %3 = vector.load %arg4[%c0_3, %c0_4] : memref<128x128xf32, #tpu.memory_space<vmem>>, vector<128x128xf32>
    tpu.vector_store %arg4[%c0_3, %c0_4], %2 {strides = array<i32>} : memref<128x128xf32, #tpu.memory_space<vmem>>, vector<128x128xf32>,
    %c0_5 = arith.constant 0 : index
    %c0_6 = arith.constant 0 : index
    %4 = vector.load %arg3[%c0_5, %c0_6] : memref<128x2xf32, #tpu.memory_space<vmem>>, vector<128x2xf32>
    %cst_7 = arith.constant dense<0.000000e+00> : vector<128x2xf32>
    %5 = tpu.matmul %2, %4, %cst_7 {dimension_numbers = #tpu.dot_dimension_numbers<[1], [0], [0], [1], [0, 0, 1, 1], [], []>} : vector<128x128xf32>, vector<128x2xf32>, vector<128x2xf32> -> vector<128x2xf32>
    %c0_8 = arith.constant 0 : index
    %c0_9 = arith.constant 0 : index
    %6 = vector.load %arg5[%c0_8, %c0_9] : memref<128x2xf32, #tpu.memory_space<vmem>>, vector<128x2xf32>
    tpu.vector_store %arg5[%c0_8, %c0_9], %5 {strides = array<i32>} : memref<128x2xf32, #tpu.memory_space<vmem>>, vector<128x2xf32>,
    return
  }
  func.func @transform_0(%arg0: i32) -> (i32, i32) {
    %c0_i32 = arith.constant 0 : i32
    %c0_i32_0 = arith.constant 0 : i32
    return %arg0, %c0_i32 : i32, i32
  }
  func.func @transform_1(%arg0: i32) -> (i32, i32) {
    %c0_i32 = arith.constant 0 : i32
    %c0_i32_0 = arith.constant 0 : i32
    %c0_i32_1 = arith.constant 0 : i32
    return %c0_i32, %c0_i32_0 : i32, i32
  }
  func.func @transform_2(%arg0: i32) -> (i32, i32) {
    %c0_i32 = arith.constant 0 : i32
    %c0_i32_0 = arith.constant 0 : i32
    %c0_i32_1 = arith.constant 0 : i32
    return %c0_i32, %c0_i32_0 : i32, i32
  }
  func.func @transform_3(%arg0: i32) -> (i32, i32) {
    %c0_i32 = arith.constant 0 : i32
    %c0_i32_0 = arith.constant 0 : i32
    return %arg0, %c0_i32 : i32, i32
  }
  func.func @transform_4(%arg0: i32) -> (i32, i32) {
    %c0_i32 = arith.constant 0 : i32
    %c0_i32_0 = arith.constant 0 : i32
    return %arg0, %c0_i32 : i32, i32
  }
}

</mosaic_0001>

<bundles_post_ra>
// kernel: tpu_custom_call.1
= control target key start
LH: loop header
LB: loop body
LE: loop exit
PB: predicated region body
PF: predicated region fallthrough
CT: control target
= control target key end

     0   :  { %10 = vsyncpa [#allocation3], 0  ;;  %s1422_s0 = inlined_call_operand.hbm [shape: f32[256,128], index: 0, kind: input, shape index: {}]   ;;  %s1423_s1 = inlined_call_operand.vmem [shape: f32[128,128], index: 1, kind: input, shape index: {}]   ;;  %s1424_s2 = inlined_call_operand.vmem [shape: f32[128,2], index: 2, kind: input, shape index: {}]   ;;  %s1425_s3 = inlined_call_operand.hbm [shape: f32[256,128], index: 3, kind: output, shape index: {0}]   ;;  %s1426_s4 = inlined_call_operand.vmem [shape: f32[256,2], index: 4, kind: output, shape index: {1}]  }
   0x1   :  { %12 = vsyncpa [#allocation3 + $0x1], 0 }
   0x2   :  { %13 = vsyncpa [#allocation4], 0 }
   0x3   :  { %15 = vsyncpa [#allocation4 + $0x1], 0  ;;  %s1093_s15 = smov 0   ;;  %s1095_s16 = smov 0  }
   0x4   :  { %s1097_s17 = smov 0   ;;  %s1099_s18 = smov 0  }
   0x5 LB: > { %s1114_s19 = sadd.s32 4294967295, %s1060_s18   ;;  %s724_s20 = sadd.s32 4294967294, %s1060_s18   ;;  %s1060_s18 = sphi %s1099_s18, %s1441_s18   ;;  %s1056_s17 = sphi %s1097_s17, %s1440_s17   ;;  %s1052_s16 = sphi %s1095_s16, %s1439_s16   ;;  %s1048_s15 = sphi %s1093_s15, %s1438_s15  }
   0x6   : > { %s1118_s21 = sadd.s32 1, %s1060_s18   ;;  %s28_s22 = sadd.s32 1, %s1056_s17 }
   0x7   : > { %s25_s23 = ssub.s32 %s1060_s18, %s1118_s21  ;;  %p35_p0 = scmp.ne.s32.totalorder %s1056_s17, %s1052_s16 }
   0x8   : > { %p26_p1 = scmp.eq.s32.totalorder %s25_s23, 0  ;;  %p36_p2 = scmp.eq.s32.totalorder %s1060_s18, 0 }
   0x9   : > { %p41_p3 = scmp.ne.s32.totalorder %s1052_s16, %s1048_s15  ;;  %p42_p4 = scmp.eq.s32.totalorder %s1114_s19, 0 }
   0xa   : > { %s1130_s24 = scalar_select %p26_p1, %s1056_s17, %s28_s22  }
   0xb   : > { %p1132_p5 = por %p36_p2, %p35_p0  ;;  %p1136_p6 = por %p42_p4, %p41_p3 }
   0xc   : > { %p107_p7 = scmp.eq.s32.totalorder %s1114_s19, 1  ;;  %p113_p8 = scmp.eq.s32.totalorder %s724_s20, 1 }
   0xd   : > { %s1430_s26 = scalar_select %p1136_p6, 1, 0 }
   0xe   : > { %p930_p10 = scmp.lt.s32.totalorder %s1060_s18, 2  ;;  %p1143_p11 = por %p107_p7, %p35_p0 }
   0xf   : > { %p1147_p12 = por %p113_p8, %p41_p3  ;;  %s165_s29 = sand.u32 1, %s1056_s17  }
  0x10   : > { %s1431_s27 = scalar_select %p1143_p11, 1, 0 }
  0x11   : > { %s1432_s28 = scalar_select %p1147_p12, 1, 0 }
  0x12   : > { %s740_s30 = sshll.u32 %s1060_s18, 11  ;;  %s727_s5 = sshll.u32 %s165_s29, 7 }
  0x13   : > { %s1156_s8 = scalar_lea.hbm %s1422_s0, %s740_s30  ;;  %s169_s9 = scalar_lea.vmem [#allocation2], %s727_s5 }
  0x14   : > { %s176_s10 = sshll.u32 %s169_s9, 4  ;;  %p1160_p13 = pnand %p930_p10, %p1132_p5  ;;  %s1164_s10 = int_to_ptr.vmem [resolvable:$true] %s176_s10 }
  0x15   : > { %s1166_s12 = scalar_lea.sflag [#allocation3], %s165_s29  ;;  %s968_s13 = scalar_lea.hbm %s1156_s8, 2048 }
  0x16   : > { %p969_p0 = scmp.ne.s32.totalorder %s1156_s8, %s968_s13  ;;  %p970_p1 = pneg %p1160_p13 }
  0x17   : > { %s973_s22 = scalar_lea.hbm %s1422_s0, 4096  ;;  %p974_p4 = scmp.lt.s32.totalorder %s1156_s8, %s1422_s0 }
  0x18   : > { %p971_p2 = pnand %p970_p1, %p969_p0  ;;  %p975_p5 = scmp.lt.s32.totalorder %s973_s22, %s968_s13 }
  0x1a   : > { %p972_p3 = pneg %p971_p2  ;;  %p976_p7 = por %p975_p5, %p974_p4 }
  0x1c   : > { %p977_p8 = pnand %p976_p7, %p972_p3 }
  0x1e   : > { %980 = shalt.err (!%p977_p8)
}
  0x1f   : > { %s981_s29 = scalar_lea.vmem %s1164_s10, 2048  ;;  %s1062_s30 = smov [#allocation2]  }
  0x20   : > { %p982_p10 = scmp.ne.s32.totalorder %s1164_s10, %s981_s29  ;;  %s986_s5 = sshll.u32 %s1062_s30, 4  ;;  %s987_s5 = int_to_ptr.vmem [resolvable:$false] %s986_s5 }
  0x21   : > { %s988_s6 = scalar_lea.vmem %s987_s5, 4096  ;;  %p989_p2 = scmp.lt.s32.totalorder %s1164_s10, %s987_s5 }
  0x22   : > { %p984_p9 = pnand %p982_p10, %p970_p1  ;;  %p990_p12 = scmp.lt.s32.totalorder %s988_s6, %s981_s29 }
  0x24   : > { %p985_p0 = pneg %p984_p9  ;;  %p991_p11 = por %p990_p12, %p989_p2 }
  0x26   : > { %p992_p6 = pnand %p991_p11, %p985_p0 }
  0x28   : > { %995 = shalt.err (!%p992_p6)
}
  0x29   : > { %s1063_s7 = smov 128   ;;  %s1064_s9 = smov 8  }
  0x2a   : > { %925 = dma.hbm_to_vmem [thread:$0]  (!%p1160_p13), %s1156_s8, 2048, %s1164_s10, %s1166_s12, %s1063_s7, %s1063_s7, %s1064_s9  }
  0x2b   : > { %p730_p9 = scmp.ge.s32.totalorder %s1060_s18, 1  ;;  %p184_p1 = scmp.lt.s32.totalorder %s1060_s18, 3 }
  0x2d   : > { %p185_p3 = pnand %p730_p9, %p184_p1 }
  0x2e   : > { %s1190_s13 = sand.u32 (!%p185_p3), 1, %s1052_s16   ;;  %p1434_p6 = scmp.ne.s32.totalorder (!%p185_p3), %s1430_s26, 0 }
  0x2f   : > { %188 = sbr.rel (%p185_p3) target bundleno = 506 (0x1fa), region = 32  ;;  %s731_s14 = sshll.u32 (!%p185_p3), %s1190_s13, 7 }
  0x30   : > { %s191_s20 = scalar_lea.sflag (!%p185_p3), [#allocation3], %s1190_s13  ;;  %s1196_s22 = scalar_lea.vmem (!%p185_p3), [#allocation2], %s731_s14 }
  0x34   : > { %1039 = dma.done.wait (%p1434_p6), %s191_s20, 2048  }
  0x35   : > { %1041 = vsyncadd (%p1434_p6), %s191_s20, 4294965248  ;;  %v263_v0 = vld [vmem:[%s1423_s1 + $0x78] sm:$0xff]  ;;  %v262_v1 = vld [vmem:[%s1423_s1 + $0x70] sm:$0xff]  ;;  %s1316_s30 = scalar_lea.vmem [#allocation5], %s731_s14  ;;  %s741_s14 = sshll.u32 %s1114_s19, 11 }
  0x36   : > { %806 = vmatprep.subr.mxu0 %v263_v0  ;;  %v261_v2 = vld [vmem:[%s1423_s1 + $0x68] sm:$0xff]  ;;  %v260_v3 = vld [vmem:[%s1423_s1 + $0x60] sm:$0xff]  ;;  %v259_v5 = vld [vmem:[%s1423_s1 + $0x58] sm:$0xff]  ;;  %s1339_s7 = scalar_lea.hbm %s1425_s3, %s741_s14  ;;  %s604_s9 = scalar_lea.sflag [#allocation4], %s1190_s13 }
  0x37   : > { %807 = vmatpush3.msra.mxu0 %v263_v0  ;;  %v232_v4 = vld [vmem:[%s1196_s22] sm:$0xff]  ;;  %v258_v6 = vld [vmem:[%s1423_s1 + $0x50] sm:$0xff]  ;;  %v257_v7 = vld [vmem:[%s1423_s1 + $0x48] sm:$0xff]  ;;  %p1435_p12 = scmp.ne.s32.totalorder %s1431_s27, 0  ;;  %s1065_s8 = smov [#allocation5]  }
  0x38   : > { %808 = vmatprep.subr.mxu0 %v262_v1  ;;  %838 = vmatprep.mubr.f32.mxu0 %v232_v4  ;;  %v440_v8 = vld [vmem:[%s1424_s2 + $0x78] sm:$0xff]  ;;  %v439_v9 = vld [vmem:[%s1424_s2 + $0x70] sm:$0xff]  ;;  %v256_v10 = vld [vmem:[%s1423_s1 + $0x40] sm:$0xff]  ;;  %s1000_s10 = sshll.u32 %s1065_s8, 4  ;;  %s1001_s10 = int_to_ptr.vmem [resolvable:$false] %s1000_s10 }
  0x39   : > { %809 = vmatpush3.msra.mxu0 %v262_v1  ;;  %862 = vmatprep.subr.mxu1 %v440_v8  ;;  %v438_v11 = vld [vmem:[%s1424_s2 + $0x68] sm:$0xff]  ;;  %v255_v12 = vld [vmem:[%s1423_s1 + $0x38] sm:$0xff]  ;;  %v437_v13 = vld [vmem:[%s1424_s2 + $0x60] sm:$0xff]  ;;  %s1002_s11 = scalar_lea.vmem %s1001_s10, 4096 }
  0x3a   : > { %810 = vmatprep.subr.mxu0 %v261_v2  ;;  %863 = vmatpush3.msra.mxu1 %v440_v8  ;;  %v254_v14 = vld [vmem:[%s1423_s1 + $0x30] sm:$0xff]  ;;  %v436_v15 = vld [vmem:[%s1424_s2 + $0x58] sm:$0xff]  ;;  %v253_v16 = vld [vmem:[%s1423_s1 + $0x28] sm:$0xff] }
  0x3b   : > { %811 = vmatpush3.msra.mxu0 %v261_v2  ;;  %864 = vmatprep.subr.mxu1 %v439_v9  ;;  %v435_v17 = vld [vmem:[%s1424_s2 + $0x50] sm:$0xff]  ;;  %v252_v18 = vld [vmem:[%s1423_s1 + $0x20] sm:$0xff]  ;;  %v434_v19 = vld [vmem:[%s1424_s2 + $0x48] sm:$0xff] }
  0x3c   : > { %812 = vmatprep.subr.mxu0 %v260_v3  ;;  %865 = vmatpush3.msra.mxu1 %v439_v9  ;;  %v251_v20 = vld [vmem:[%s1423_s1 + $0x18] sm:$0xff]  ;;  %v433_v21 = vld [vmem:[%s1424_s2 + $0x40] sm:$0xff]  ;;  %v250_v22 = vld [vmem:[%s1423_s1 + $0x10] sm:$0xff] }
  0x3d   : > { %813 = vmatpush3.msra.mxu0 %v260_v3  ;;  %866 = vmatprep.subr.mxu1 %v438_v11  ;;  %v432_v23 = vld [vmem:[%s1424_s2 + $0x38] sm:$0xff]  ;;  %v249_v24 = vld [vmem:[%s1423_s1 + $0x8] sm:$0xff]  ;;  %v431_v25 = vld [vmem:[%s1424_s2 + $0x30] sm:$0xff] }
  0x3e   : > { %814 = vmatprep.subr.mxu0 %v259_v5  ;;  %867 = vmatpush3.msra.mxu1 %v438_v11  ;;  %v248_v26 = vld [vmem:[%s1423_s1] sm:$0xff]  ;;  %v430_v27 = vld [vmem:[%s1424_s2 + $0x28] sm:$0xff]  ;;  %v234_v30 = vld [vmem:[%s1196_s22 + $0x10] sm:$0xff] }
  0x3f   : > { %815 = vmatpush3.msra.mxu0 %v259_v5  ;;  %868 = vmatprep.subr.mxu1 %v437_v13  ;;  %v233_v28 = vld [vmem:[%s1196_s22 + $0x8] sm:$0xff]  ;;  %v429_v29 = vld [vmem:[%s1424_s2 + $0x20] sm:$0xff]  ;;  %v428_v31 = vld [vmem:[%s1424_s2 + $0x18] sm:$0xff] }
  0x40   : > { %816 = vmatprep.subr.mxu0 %v258_v6  ;;  %869 = vmatpush3.msra.mxu1 %v437_v13  ;;  %v235_v32 = vld [vmem:[%s1196_s22 + $0x18] sm:$0xff]  ;;  %v427_v33 = vld [vmem:[%s1424_s2 + $0x10] sm:$0xff]  ;;  %v236_v34 = vld [vmem:[%s1196_s22 + $0x20] sm:$0xff] }
  0x41   : > { %817 = vmatpush3.msra.mxu0 %v258_v6  ;;  %870 = vmatprep.subr.mxu1 %v436_v15  ;;  %v237_v35 = vld [vmem:[%s1196_s22 + $0x28] sm:$0xff]  ;;  %v238_v36 = vld [vmem:[%s1196_s22 + $0x30] sm:$0xff]  ;;  %v239_v37 = vld [vmem:[%s1196_s22 + $0x38] sm:$0xff] }
  0x42   : > { %818 = vmatprep.subr.mxu0 %v257_v7  ;;  %871 = vmatpush3.msra.mxu1 %v436_v15  ;;  %v240_v38 = vld [vmem:[%s1196_s22 + $0x40] sm:$0xff]  ;;  %v241_v39 = vld [vmem:[%s1196_s22 + $0x48] sm:$0xff]  ;;  %v242_v40 = vld [vmem:[%s1196_s22 + $0x50] sm:$0xff] }
  0x43   : > { %819 = vmatpush3.msra.mxu0 %v257_v7  ;;  %872 = vmatprep.subr.mxu1 %v435_v17  ;;  %v243_v41 = vld [vmem:[%s1196_s22 + $0x58] sm:$0xff]  ;;  %v244_v42 = vld [vmem:[%s1196_s22 + $0x60] sm:$0xff]  ;;  %v245_v43 = vld [vmem:[%s1196_s22 + $0x68] sm:$0xff] }
  0x44   : > { %820 = vmatprep.subr.mxu0 %v256_v10  ;;  %873 = vmatpush3.msra.mxu1 %v435_v17  ;;  %v246_v44 = vld [vmem:[%s1196_s22 + $0x70] sm:$0xff]  ;;  %v247_v45 = vld [vmem:[%s1196_s22 + $0x78] sm:$0xff]  ;;  %v426_v46 = vld [vmem:[%s1424_s2 + $0x8] sm:$0xff]  ;;  %s622_s22 = sshll.u32 %s1316_s30, 4  ;;  %s1341_s22 = int_to_ptr.vmem [resolvable:$true] %s622_s22 }
  0x45   : > { %821 = vmatpush3.msra.mxu0 %v256_v10  ;;  %874 = vmatprep.subr.mxu1 %v434_v19  ;;  %v425_v47 = vld [vmem:[%s1424_s2] sm:$0xff]  ;;  %s996_s20 = scalar_lea.vmem %s1341_s22, 2048  ;;  %p1003_p5 = scmp.lt.s32.totalorder %s1341_s22, %s1001_s10 }
  0x46   : > { %822 = vmatprep.subr.mxu0 %v255_v12  ;;  %875 = vmatpush3.msra.mxu1 %v434_v19  ;;  %p997_p11 = scmp.ne.s32.totalorder %s1341_s22, %s996_s20  ;;  %p1004_p7 = scmp.lt.s32.totalorder %s1002_s11, %s996_s20 }
  0x47   : > { %823 = vmatpush3.msra.mxu0 %v255_v12  ;;  %876 = vmatprep.subr.mxu1 %v433_v21 }
  0x48   : > { %824 = vmatprep.subr.mxu0 %v254_v14  ;;  %877 = vmatpush3.msra.mxu1 %v433_v21  ;;  %p998_p13 = pnand %p997_p11, %p1435_p12  ;;  %p1005_p8 = por %p1004_p7, %p1003_p5 }
  0x49   : > { %825 = vmatpush3.msra.mxu0 %v254_v14  ;;  %878 = vmatprep.subr.mxu1 %v432_v23 }
  0x4a   : > { %826 = vmatprep.subr.mxu0 %v253_v16  ;;  %879 = vmatpush3.msra.mxu1 %v432_v23  ;;  %p999_p4 = pneg %p998_p13 }
  0x4b   : > { %827 = vmatpush3.msra.mxu0 %v253_v16  ;;  %880 = vmatprep.subr.mxu1 %v431_v25 }
  0x4c   : > { %828 = vmatprep.subr.mxu0 %v252_v18  ;;  %881 = vmatpush3.msra.mxu1 %v431_v25  ;;  %p1006_p10 = pnand %p1005_p8, %p999_p4 }
  0x4d   : > { %829 = vmatpush3.msra.mxu0 %v252_v18  ;;  %882 = vmatprep.subr.mxu1 %v430_v27 }
  0x4e   : > { %830 = vmatprep.subr.mxu0 %v251_v20  ;;  %883 = vmatpush3.msra.mxu1 %v430_v27 }
  0x4f   : > { %831 = vmatpush3.msra.mxu0 %v251_v20  ;;  %884 = vmatprep.subr.mxu1 %v429_v29 }
  0x50   : > { %832 = vmatprep.subr.mxu0 %v250_v22  ;;  %885 = vmatpush3.msra.mxu1 %v429_v29 }
  0x51   : > { %833 = vmatpush3.msra.mxu0 %v250_v22  ;;  %886 = vmatprep.subr.mxu1 %v428_v31 }
  0x52   : > { %834 = vmatprep.subr.mxu0 %v249_v24  ;;  %887 = vmatpush3.msra.mxu1 %v428_v31 }
  0x53   : > { %835 = vmatpush3.msra.mxu0 %v249_v24  ;;  %888 = vmatprep.subr.mxu1 %v427_v33 }
  0x54   : > { %836 = vmatprep.subr.mxu0 %v248_v26  ;;  %889 = vmatpush3.msra.mxu1 %v427_v33 }
  0x55   : > { %837 = vmatpush3.msra.mxu0 %v248_v26  ;;  %890 = vmatprep.subr.mxu1 %v426_v46 }
  0x56   : > { %839 = vmatmul.mubr.f32.vlgmr.msra.gmra.mxu0 %v233_v28  ;;  %891 = vmatpush3.msra.mxu1 %v426_v46 }
  0x57   : > { %841 = vmatprep.mubr.f32.mxu0 %v234_v30  ;;  %892 = vmatprep.subr.mxu1 %v425_v47 }
  0x58   : > { %893 = vmatpush3.msra.mxu1 %v425_v47 }
  0x5a   : > { %842 = vmatmul.mubr.f32.gmra.mxu0 %v235_v32 }
  0x5b   : > { %844 = vmatprep.mubr.f32.mxu0 %v236_v34 }
  0x5e   : > { %845 = vmatmul.mubr.f32.gmra.mxu0 %v237_v35 }
  0x5f   : > { %847 = vmatprep.mubr.f32.mxu0 %v238_v36 }
  0x62   : > { %848 = vmatmul.mubr.f32.gmra.mxu0 %v239_v37 }
  0x63   : > { %850 = vmatprep.mubr.f32.mxu0 %v240_v38 }
  0x66   : > { %851 = vmatmul.mubr.f32.gmra.mxu0 %v241_v39 }
  0x67   : > { %853 = vmatprep.mubr.f32.mxu0 %v242_v40 }
  0x6a   : > { %854 = vmatmul.mubr.f32.gmra.mxu0 %v243_v41 }
  0x6b   : > { %856 = vmatprep.mubr.f32.mxu0 %v244_v42 }
  0x6e   : > { %857 = vmatmul.mubr.f32.gmra.mxu0 %v245_v43 }
  0x6f   : > { %859 = vmatprep.mubr.f32.mxu0 %v246_v44 }
  0x72   : > { %860 = vmatmul.mubr.f32.gmra.mxu0 %v247_v45 }
 0x116   : > { %v840_v48 = vpop.f32.mrf.mxu0 }
 0x117   : > { %410 = vst [vmem:[%s1316_s30 + $0x8] sm:$0xff] %v840_v48 }
 0x118   : > { %v330_v49 = vpop.f32.mrf.mxu0 }
 0x119   : > { %409 = vst [vmem:[%s1316_s30] sm:$0xff] %v330_v49  ;;  %894 = vmatprep.mubr.f32.mxu1 %v330_v49 }
 0x11a   : > { %v843_v50 = vpop.f32.mrf.mxu0  ;;  %895 = vmatmul.mubr.f32.vlgmr.msra.gmra.mxu1 %v840_v48 }
 0x11b   : > { %412 = vst [vmem:[%s1316_s30 + $0x18] sm:$0xff] %v843_v50 }
 0x11c   : > { %v340_v51 = vpop.f32.mrf.mxu0 }
 0x11d   : > { %411 = vst [vmem:[%s1316_s30 + $0x10] sm:$0xff] %v340_v51  ;;  %897 = vmatprep.mubr.f32.mxu1 %v340_v51 }
 0x11e   : > { %v846_v52 = vpop.f32.mrf.mxu0  ;;  %898 = vmatmul.mubr.f32.gmra.mxu1 %v843_v50 }
 0x11f   : > { %414 = vst [vmem:[%s1316_s30 + $0x28] sm:$0xff] %v846_v52 }
 0x120   : > { %v350_v53 = vpop.f32.mrf.mxu0 }
 0x121   : > { %413 = vst [vmem:[%s1316_s30 + $0x20] sm:$0xff] %v350_v53  ;;  %900 = vmatprep.mubr.f32.mxu1 %v350_v53 }
 0x122   : > { %v849_v54 = vpop.f32.mrf.mxu0  ;;  %901 = vmatmul.mubr.f32.gmra.mxu1 %v846_v52 }
 0x123   : > { %416 = vst [vmem:[%s1316_s30 + $0x38] sm:$0xff] %v849_v54 }
 0x124   : > { %v360_v55 = vpop.f32.mrf.mxu0 }
 0x125   : > { %415 = vst [vmem:[%s1316_s30 + $0x30] sm:$0xff] %v360_v55  ;;  %903 = vmatprep.mubr.f32.mxu1 %v360_v55 }
 0x126   : > { %v852_v56 = vpop.f32.mrf.mxu0  ;;  %904 = vmatmul.mubr.f32.gmra.mxu1 %v849_v54 }
 0x127   : > { %418 = vst [vmem:[%s1316_s30 + $0x48] sm:$0xff] %v852_v56 }
 0x128   : > { %v370_v57 = vpop.f32.mrf.mxu0 }
 0x129   : > { %417 = vst [vmem:[%s1316_s30 + $0x40] sm:$0xff] %v370_v57  ;;  %906 = vmatprep.mubr.f32.mxu1 %v370_v57 }
 0x12a   : > { %v855_v58 = vpop.f32.mrf.mxu0  ;;  %907 = vmatmul.mubr.f32.gmra.mxu1 %v852_v56 }
 0x12b   : > { %420 = vst [vmem:[%s1316_s30 + $0x58] sm:$0xff] %v855_v58 }
 0x12c   : > { %v380_v59 = vpop.f32.mrf.mxu0 }
 0x12d   : > { %419 = vst [vmem:[%s1316_s30 + $0x50] sm:$0xff] %v380_v59  ;;  %909 = vmatprep.mubr.f32.mxu1 %v380_v59 }
 0x12e   : > { %v858_v60 = vpop.f32.mrf.mxu0  ;;  %910 = vmatmul.mubr.f32.gmra.mxu1 %v855_v58 }
 0x12f   : > { %422 = vst [vmem:[%s1316_s30 + $0x68] sm:$0xff] %v858_v60 }
 0x130   : > { %v390_v61 = vpop.f32.mrf.mxu0 }
 0x131   : > { %421 = vst [vmem:[%s1316_s30 + $0x60] sm:$0xff] %v390_v61  ;;  %912 = vmatprep.mubr.f32.mxu1 %v390_v61 }
 0x132   : > { %v861_v62 = vpop.f32.mrf.mxu0  ;;  %913 = vmatmul.mubr.f32.gmra.mxu1 %v858_v60 }
 0x133   : > { %424 = vst [vmem:[%s1316_s30 + $0x78] sm:$0xff] %v861_v62 }
 0x134   : > { %v400_v63 = vpop.f32.mrf.mxu0 }
 0x135   : > { %423 = vst [vmem:[%s1316_s30 + $0x70] sm:$0xff] %v400_v63  ;;  %915 = vmatprep.mubr.f32.mxu1 %v400_v63 }
 0x136   : > { %916 = vmatmul.mubr.f32.gmra.mxu1 %v861_v62 }
 0x137   : > { %1009 = shalt.err (!%p1006_p10)
}
 0x138   : > { %s1010_s12 = scalar_lea.hbm %s1339_s7, 2048  ;;  %s1014_s29 = scalar_lea.hbm %s1425_s3, 4096 }
 0x139   : > { %p1011_p0 = scmp.ne.s32.totalorder %s1339_s7, %s1010_s12  ;;  %p1015_p1 = scmp.lt.s32.totalorder %s1339_s7, %s1425_s3 }
 0x13a   : > { %p1016_p3 = scmp.lt.s32.totalorder %s1014_s29, %s1010_s12 }
 0x13b   : > { %p1012_p2 = pnand %p1011_p0, %p1435_p12 }
 0x13c   : > { %p1017_p6 = por %p1016_p3, %p1015_p1 }
 0x13d   : > { %p1013_p9 = pneg %p1012_p2 }
 0x13f   : > { %p1018_p11 = pnand %p1017_p6, %p1013_p9 }
 0x141   : > { %1021 = shalt.err (!%p1018_p11)
}
 0x142   : > { %s1066_s14 = smov 128   ;;  %s1067_s5 = smov 8   ;;  %vm586_vm0 = vcmask 15360  }
 0x143   : > { %920 = dma.vmem_to_hbm [thread:$0]  (%p1435_p12), %s1341_s22, 2048, %s1339_s7, %s604_s9, %s1066_s14, %s1066_s14, %s1067_s5  }
 0x144   : > { %s733_s6 = sshll.u32 %s1114_s19, 4 }
 0x145   : > { %p227_p13 = scmp.lt.s32.totalorder %s733_s6, 31 }
 0x147   : > { %s1443_s6 = smov (!%p227_p13, %s733_s6), 31 }
 0x148   : > { %s734_s20 = sshll.u32 %s1443_s6, 3 }
 0x149   : > { %s1370_s11 = scalar_lea.vmem %s1426_s4, %s734_s20 }
 0x1da   : > { %v896_v0 = vpop.f32.mrf.mxu1 }
 0x1db   : > { %588 = vst.msk [vmem:[%s1370_s11 + $0x8] sm:$0xff] %vm586_vm0, %v896_v0 }
 0x1dc   : > { %v507_v1 = vpop.f32.mrf.mxu1 }
 0x1dd   : > { %587 = vst.msk [vmem:[%s1370_s11] sm:$0xff] %vm586_vm0, %v507_v1 }
 0x1de   : > { %v899_v2 = vpop.f32.mrf.mxu1 }
 0x1df   : > { %590 = vst.msk [vmem:[%s1370_s11 + $0x18] sm:$0xff] %vm586_vm0, %v899_v2 }
 0x1e0   : > { %v517_v3 = vpop.f32.mrf.mxu1 }
 0x1e1   : > { %589 = vst.msk [vmem:[%s1370_s11 + $0x10] sm:$0xff] %vm586_vm0, %v517_v3 }
 0x1e2   : > { %v902_v4 = vpop.f32.mrf.mxu1 }
 0x1e3   : > { %592 = vst.msk [vmem:[%s1370_s11 + $0x28] sm:$0xff] %vm586_vm0, %v902_v4 }
 0x1e4   : > { %v527_v5 = vpop.f32.mrf.mxu1 }
 0x1e5   : > { %591 = vst.msk [vmem:[%s1370_s11 + $0x20] sm:$0xff] %vm586_vm0, %v527_v5 }
 0x1e6   : > { %v905_v6 = vpop.f32.mrf.mxu1 }
 0x1e7   : > { %594 = vst.msk [vmem:[%s1370_s11 + $0x38] sm:$0xff] %vm586_vm0, %v905_v6 }
 0x1e8   : > { %v537_v7 = vpop.f32.mrf.mxu1 }
 0x1e9   : > { %593 = vst.msk [vmem:[%s1370_s11 + $0x30] sm:$0xff] %vm586_vm0, %v537_v7 }
 0x1ea   : > { %v908_v8 = vpop.f32.mrf.mxu1 }
 0x1eb   : > { %596 = vst.msk [vmem:[%s1370_s11 + $0x48] sm:$0xff] %vm586_vm0, %v908_v8 }
 0x1ec   : > { %v547_v9 = vpop.f32.mrf.mxu1 }
 0x1ed   : > { %595 = vst.msk [vmem:[%s1370_s11 + $0x40] sm:$0xff] %vm586_vm0, %v547_v9 }
 0x1ee   : > { %v911_v10 = vpop.f32.mrf.mxu1 }
 0x1ef   : > { %598 = vst.msk [vmem:[%s1370_s11 + $0x58] sm:$0xff] %vm586_vm0, %v911_v10 }
 0x1f0   : > { %v557_v11 = vpop.f32.mrf.mxu1 }
 0x1f1   : > { %597 = vst.msk [vmem:[%s1370_s11 + $0x50] sm:$0xff] %vm586_vm0, %v557_v11 }
 0x1f2   : > { %v914_v12 = vpop.f32.mrf.mxu1 }
 0x1f3   : > { %600 = vst.msk [vmem:[%s1370_s11 + $0x68] sm:$0xff] %vm586_vm0, %v914_v12 }
 0x1f4   : > { %v567_v13 = vpop.f32.mrf.mxu1 }
 0x1f5   : > { %599 = vst.msk [vmem:[%s1370_s11 + $0x60] sm:$0xff] %vm586_vm0, %v567_v13 }
 0x1f6   : > { %v917_v14 = vpop.f32.mrf.mxu1 }
 0x1f7   : > { %602 = vst.msk [vmem:[%s1370_s11 + $0x78] sm:$0xff] %vm586_vm0, %v917_v14 }
 0x1f8   : > { %v577_v15 = vpop.f32.mrf.mxu1 }
 0x1f9   : > { %601 = vst.msk [vmem:[%s1370_s11 + $0x70] sm:$0xff] %vm586_vm0, %v577_v15 }
 0x1fa PF: > { %s641_s19 = sand.u32 1, %s1048_s15   ;;  %p1436_p12 = scmp.ne.s32.totalorder %s1432_s28, 0 }
 0x1fb   : > { %p1437_p4 = scmp.ge.s32.totalorder %s1060_s18, 2  ;;  %s642_s27 = scalar_lea.sflag [#allocation4], %s641_s19 }
 0x1fd   : > { %p927_p5 = pnand %p1437_p4, %p1436_p12 }
 0x1ff   : > { %p928_p7 = pneg %p927_p5 }
 0x201   : > { %1043 = dma.done.wait (%p928_p7), %s642_s27, 2048  }
 0x202   : > { %1045 = vsyncadd (%p928_p7), %s642_s27, 4294965248  ;;  %p18_p8 = scmp.ge.s32.totalorder %s1118_s21, 4   ;;  %s1438_s15 = smov %s1052_s16 }
 0x203   : > { %s1439_s16 = smov %s1056_s17  ;;  %s1440_s17 = smov %s1130_s24 }
 0x204   : > { %s1441_s18 = smov %s1118_s21  ;;  %20 = sbr.rel (!%p18_p8) target bundleno = 5 (0x5), region = 89 }
 0x209   :  { %655 = vsyncpa [#allocation3], 1 }
 0x20a   :  { %657 = vsyncpa [#allocation3 + $0x1], 1 }
 0x20b   :  { %658 = vsyncpa [#allocation4], 1 }
 0x20c   :  { %660 = vsyncpa [#allocation4 + $0x1], 1 }

</bundles_post_ra>
